<compile_context>
chip_gen: v6e
topology: v6e:2x2x1
jax: 0.10.0
libtpu: 0.0.40
codegen_flags: <defaults>
</compile_context>

<pallas_src>
import functools

import jax
import jax.numpy as jnp
from jax.experimental import pallas as pl
from jax.experimental.pallas import tpu as pltpu


def _round_up(x, m):
    return ((x + m - 1) // m) * m


def _largest_divisor(n, candidates):
    for c in candidates:
        if c <= n and n % c == 0:
            return c
    return n


def _vmem_limit_bytes():
    """Generation-aware VMEM budget: ~70% of per-core VMEM, capped at 96 MiB."""
    cap = 64 * 1024 * 1024  # conservative fallback (v7x per-TC VMEM)
    try:
        info = pltpu.get_tpu_info()
        cap = int(getattr(info, "vmem_capacity_bytes", cap))
    except Exception:
        pass
    return min(96 * 1024 * 1024, int(cap * 0.7))


def _choose_tiles(Bp, Ep, Cp, vmem_limit_bytes, tk_cap=None):
    """Pick (tm, tn, tk). tm | Bp, tn | Cp, tk | Ep. tk == Ep collapses the K axis."""
    tm = _largest_divisor(Bp, (256, 128, 64, 32, 16, 8))
    tn = _largest_divisor(Cp, (512, 256, 128))
    budget = int(vmem_limit_bytes * 0.75)

    def need(tk):
        # double-buffered bf16 x/w tiles + resident f32 out tile + f32 bias tiles
        return 2 * (tm * tk * 2) + 2 * (tk * tn * 2) + tm * tn * 4 + 2 * tn * 4

    max_tk = Ep if tk_cap is None else min(Ep, tk_cap)
    if max_tk == Ep and need(Ep) <= budget:
        return tm, tn, Ep  # single K block

    tk = 128
    for cand in (2048, 1024, 512, 256, 128):
        if cand <= max_tk and Ep % cand == 0 and need(cand) <= budget:
            tk = cand
            break
    return tm, tn, tk


def _single_k_kernel(x_ref, w_ref, b_ref, o_ref):
    # x_ref: (tm, Ep) bf16, w_ref: (Ep, tn) bf16, b_ref: (1, tn) f32, o_ref: (tm, tn) f32
    o_ref[...] = (
        jnp.dot(x_ref[...], w_ref[...], preferred_element_type=jnp.float32)
        + b_ref[...]
    )


def _tiled_k_kernel(x_ref, w_ref, b_ref, o_ref):
    # x_ref: (tm, tk) bf16, w_ref: (tk, tn) bf16, b_ref: (1, tn) f32, o_ref: (tm, tn) f32
    # o_ref's block index is constant across k -> it is the resident accumulator.
    k = pl.program_id(2)

    @pl.when(k == 0)
    def _():
        o_ref[...] = jnp.broadcast_to(b_ref[...], o_ref.shape)

    o_ref[...] += jnp.dot(
        x_ref[...], w_ref[...], preferred_element_type=jnp.float32
    )


def prepare_classifier_params(weight, bias):
    """One-time prep (outside the hot path).

    weight: (C, E) PyTorch nn.Linear layout; bias: (C,).
    Returns:
      w_t_padded: (Ep, Cp) bf16, pre-transposed + zero-padded weight (128-aligned).
      b_padded:   (1, Cp)  f32,  zero-padded bias.
    """
    C, E = weight.shape
    Ep = _round_up(E, 128)
    Cp = _round_up(C, 128)
    w_t = jnp.transpose(weight, (1, 0)).astype(jnp.bfloat16)      # (E, C)
    w_t_padded = jnp.pad(w_t, ((0, Ep - E), (0, Cp - C)))          # (Ep, Cp)
    b_padded = jnp.pad(bias.astype(jnp.float32), (0, Cp - C)).reshape(1, Cp)
    return w_t_padded, b_padded
    # TODO(synk): optional fp8 weight path with per-channel scales for v7x.


@functools.partial(
    jax.jit, static_argnames=("num_classes", "force_pallas", "_tk_cap")
)
def classification_forward(
    x, w_t_padded, b_padded, *, num_classes, force_pallas=False, _tk_cap=None
):
    """x: (B, 1, E); w_t_padded: (Ep, Cp) bf16; b_padded: (1, Cp) f32.

    Returns (B, num_classes) f32 logits.
    """
    x2d = jnp.squeeze(x, axis=1).astype(jnp.bfloat16)   # (B, E) -- glue
    B, E = x2d.shape
    Ep, Cp = w_t_padded.shape

    # Fast path for tiny heads: XLA's fused dot beats pallas_call launch+pad+slice.
    if (not force_pallas) and B <= 256 and Ep <= 512 and Cp <= 256:
        logits = jnp.dot(x2d, w_t_padded[:E], preferred_element_type=jnp.float32)
        logits = logits + b_padded[0]
        return logits[:, :num_classes]

    vmem_limit = _vmem_limit_bytes()

    Bp = _round_up(B, 8)                 # sublane pad only, never to the M tile
    tm, tn, tk = _choose_tiles(Bp, Ep, Cp, vmem_limit, tk_cap=_tk_cap)

    pad_b = Bp - B
    pad_e = Ep - E                       # zero for realistic (128-aligned) E
    if pad_b or pad_e:
        x_p = jnp.pad(x2d, ((0, pad_b), (0, pad_e)))
    else:
        x_p = x2d

    if tk == Ep:
        # Collapsed K: single reduction block, fully "parallel" 2-D grid.
        grid = (Bp // tm, Cp // tn)
        out_padded = pl.pallas_call(
            _single_k_kernel,
            out_shape=jax.ShapeDtypeStruct((Bp, Cp), jnp.float32),
            grid_spec=pltpu.PrefetchScalarGridSpec(
                num_scalar_prefetch=0,
                grid=grid,
                in_specs=[
                    pl.BlockSpec((tm, Ep), lambda i, j: (i, 0)),   # x tile
                    pl.BlockSpec((Ep, tn), lambda i, j: (0, j)),   # W tile
                    pl.BlockSpec((1, tn), lambda i, j: (0, j)),    # bias tile
                ],
                out_specs=pl.BlockSpec((tm, tn), lambda i, j: (i, j)),
            ),
            compiler_params=pltpu.CompilerParams(
                dimension_semantics=("parallel", "parallel"),
                vmem_limit_bytes=vmem_limit,
            ),
        )(x_p, w_t_padded, b_padded)
    else:
        # Tiled K: f32 output tile is the resident accumulator (no scratch).
        grid = (Bp // tm, Cp // tn, Ep // tk)
        out_padded = pl.pallas_call(
            _tiled_k_kernel,
            out_shape=jax.ShapeDtypeStruct((Bp, Cp), jnp.float32),
            grid_spec=pltpu.PrefetchScalarGridSpec(
                num_scalar_prefetch=0,
                grid=grid,
                in_specs=[
                    pl.BlockSpec((tm, tk), lambda i, j, k: (i, k)),   # x tile
                    pl.BlockSpec((tk, tn), lambda i, j, k: (k, j)),   # W tile
                    pl.BlockSpec((1, tn), lambda i, j, k: (0, j)),    # bias tile
                ],
                out_specs=pl.BlockSpec((tm, tn), lambda i, j, k: (i, j)),
            ),
            compiler_params=pltpu.CompilerParams(
                dimension_semantics=("parallel", "parallel", "arbitrary"),
                vmem_limit_bytes=vmem_limit,
            ),
        )(x_p, w_t_padded, b_padded)

    # Slice the real logits back out of the lane-padded block (glue).
    return out_padded[:B, :num_classes]


def _ref_logits(x, weight, bias):
    """Reference matching the kernel's numerics: bf16 inputs, f32 accumulate."""
    x_bf = jnp.squeeze(x, axis=1).astype(jnp.bfloat16).astype(jnp.float32)
    w_bf = weight.astype(jnp.bfloat16).astype(jnp.float32)
    return x_bf @ w_bf.T + bias.astype(jnp.float32)


if __name__ == "__main__":
    key = jax.random.PRNGKey(0)

    # --- Check 1: module-consistent small shapes (batch=2, E=32, C=8),
    #     single-K-block Pallas path forced. ---
    batch, embedding_dim, num_classes = 2, 32, 8
    k1, k2, k3, key = jax.random.split(key, 4)
    x = jax.random.normal(k1, (batch, 1, embedding_dim), dtype=jnp.float32)
    weight = jax.random.normal(k2, (num_classes, embedding_dim), dtype=jnp.float32) * 0.1
    bias = jax.random.normal(k3, (num_classes,), dtype=jnp.float32) * 0.1

    w_t_p, b_p = prepare_classifier_params(weight, bias)
    out = classification_forward(x, w_t_p, b_p, num_classes=num_classes,
                                 force_pallas=True)
    out = jax.block_until_ready(out)
    ref = _ref_logits(x, weight, bias)
    assert out.shape == (batch, num_classes)
    assert jnp.allclose(out, ref, atol=1e-4, rtol=1e-4)

    # --- Check 2: exercises B/C padding + tiled-K accumulator path
    #     (tk capped to 128 so the 3-D grid runs even at small E). ---
    batch2, embedding_dim2, num_classes2 = 12, 512, 200
    k1, k2, k3, key = jax.random.split(key, 4)
    x2 = jax.random.normal(k1, (batch2, 1, embedding_dim2), dtype=jnp.float32)
    w2 = jax.random.normal(k2, (num_classes2, embedding_dim2), dtype=jnp.float32) * 0.1
    b2 = jax.random.normal(k3, (num_classes2,), dtype=jnp.float32) * 0.1

    w2_t_p, b2_p = prepare_classifier_params(w2, b2)
    out2 = classification_forward(x2, w2_t_p, b2_p, num_classes=num_classes2,
                                  force_pallas=True, _tk_cap=128)
    out2 = jax.block_until_ready(out2)
    ref2 = _ref_logits(x2, w2, b2)
    assert out2.shape == (batch2, num_classes2)
    assert jnp.allclose(out2, ref2, atol=2e-4, rtol=1e-3)

    print("KERNEL_OK")
</pallas_src>

<mosaic_0001>
module attributes {stable_mosaic.version = 11 : i64} {
  func.func @_single_k_kernel(%arg0: i32, %arg1: i32, %arg2: memref<8x128xbf16, #tpu.memory_space<vmem>>, %arg3: memref<128x128xbf16, #tpu.memory_space<vmem>>, %arg4: memref<1x128xf32, #tpu.memory_space<vmem>>, %arg5: memref<8x128xf32, #tpu.memory_space<vmem>>) attributes {dimension_semantics = [#tpu.dimension_semantics<parallel>, #tpu.dimension_semantics<parallel>], iteration_bounds = array<i64: 1, 1>, scalar_prefetch = 0 : i64, scratch_operands = 0 : i64, tpu.core_type = #tpu.core_type<tc>, window_params = [{transform_indices = @transform_0, window_bounds = array<i64: 8, 128>}, {transform_indices = @transform_1, window_bounds = array<i64: 128, 128>}, {transform_indices = @transform_2, window_bounds = array<i64: 1, 128>}, {transform_indices = @transform_3, window_bounds = array<i64: 8, 128>}]} {
    %c0 = arith.constant 0 : index
    %c0_0 = arith.constant 0 : index
    %0 = vector.load %arg2[%c0, %c0_0] : memref<8x128xbf16, #tpu.memory_space<vmem>>, vector<8x128xbf16>
    %c0_1 = arith.constant 0 : index
    %c0_2 = arith.constant 0 : index
    %1 = vector.load %arg3[%c0_1, %c0_2] : memref<128x128xbf16, #tpu.memory_space<vmem>>, vector<128x128xbf16>
    %cst = arith.constant dense<0.000000e+00> : vector<8x128xf32>
    %2 = tpu.matmul %0, %1, %cst {dimension_numbers = #tpu.dot_dimension_numbers<[1], [0], [0], [1], [0, 0, 1, 1], [], []>} : vector<8x128xbf16>, vector<128x128xbf16>, vector<8x128xf32> -> vector<8x128xf32>
    %c0_3 = arith.constant 0 : index
    %c0_4 = arith.constant 0 : index
    %3 = vector.load %arg4[%c0_3, %c0_4] : memref<1x128xf32, #tpu.memory_space<vmem>>, vector<1x128xf32>
    %4 = vector.broadcast %3 : vector<1x128xf32> to vector<8x128xf32>
    %5 = arith.addf %2, %4 : vector<8x128xf32>
    %c0_5 = arith.constant 0 : index
    %c0_6 = arith.constant 0 : index
    %6 = vector.load %arg5[%c0_5, %c0_6] : memref<8x128xf32, #tpu.memory_space<vmem>>, vector<8x128xf32>
    tpu.vector_store %arg5[%c0_5, %c0_6], %5 {strides = array<i32>} : memref<8x128xf32, #tpu.memory_space<vmem>>, vector<8x128xf32>,
    return
  }
  func.func @transform_0(%arg0: i32, %arg1: i32) -> (i32, i32) {
    %c0_i32 = arith.constant 0 : i32
    %c0_i32_0 = arith.constant 0 : i32
    return %arg0, %c0_i32 : i32, i32
  }
  func.func @transform_1(%arg0: i32, %arg1: i32) -> (i32, i32) {
    %c0_i32 = arith.constant 0 : i32
    %c0_i32_0 = arith.constant 0 : i32
    return %c0_i32, %arg1 : i32, i32
  }
  func.func @transform_2(%arg0: i32, %arg1: i32) -> (i32, i32) {
    %c0_i32 = arith.constant 0 : i32
    %c0_i32_0 = arith.constant 0 : i32
    return %c0_i32, %arg1 : i32, i32
  }
  func.func @transform_3(%arg0: i32, %arg1: i32) -> (i32, i32) {
    %c0_i32 = arith.constant 0 : i32
    return %arg0, %arg1 : i32, i32
  }
}

</mosaic_0001>

<bundles_post_ra>
// kernel: classification_forward.1
= control target key start
LH: loop header
LB: loop body
LE: loop exit
PB: predicated region body
PF: predicated region fallthrough
CT: control target
= control target key end

     0   :  { %8 = vsyncpa [#allocation3], 0  ;;  %s220_s12 = smov [#allocation2]   ;;  %s257_s0 = inlined_call_operand.vmem [shape: bf16[8,128], index: 0, kind: input, shape index: {}]   ;;  %s258_s1 = inlined_call_operand.hbm [shape: bf16[128,128], index: 1, kind: input, shape index: {}]   ;;  %s259_s2 = inlined_call_operand.vmem [shape: f32[1,128], index: 2, kind: input, shape index: {}]   ;;  %s260_s3 = inlined_call_operand.vmem [shape: f32[8,128], index: 3, kind: output, shape index: {}]  }
   0x1   :  { %s16_s13 = sshll.u32 %s220_s12, 4  ;;  %s17_s13 = int_to_ptr.vmem [resolvable:$true] %s16_s13 }
   0x2   :  { %s206_s14 = scalar_lea.vmem %s17_s13, 1024  ;;  %p211_p1 = scmp.lt.s32.totalorder %s17_s13, %s17_s13 }
   0x3   :  { %p207_p0 = scmp.ne.s32.totalorder %s17_s13, %s206_s14  ;;  %p212_p2 = scmp.lt.s32.totalorder %s206_s14, %s206_s14 }
   0x5   :  { %p213_p3 = por %p212_p2, %p211_p1 }
   0x7   :  { %p214_p4 = pnand %p213_p3, %p207_p0 }
   0x9   :  { %217 = shalt.err (!%p214_p4)
}
   0xa   :  { %s221_s15 = smov 64   ;;  %s222_s16 = smov 4  }
   0xb   :  { %22 = dma.hbm_to_vmem [thread:$0]  %s258_s1, 1024, %s17_s13, [#allocation3], %s221_s15, %s221_s15, %s222_s16  }
   0xc   :  { %218 = dma.done.wait [#allocation3], 1024  }
   0xd   :  { %219 = vsyncadd [#allocation3], 4294966272  ;;  %v223_v0 = vmov 0.0   ;;  %vm224_vm0 = vmmov 0   ;;  %v190_v1 = vld [vmem:[#allocation2 + $0x38] sm:$0xff]   ;;  %v191_v2 = vld [vmem:[#allocation2 + $0x30] sm:$0xff]  }
   0xe   :  { %165 = vmatprep.subr.bf16.mxu0 %v223_v0  ;;  %181 = vmatprep.mubr.msk.bf16.mxu0 %vm224_vm0, %v223_v0  ;;  %v192_v3 = vld [vmem:[#allocation2 + $0x28] sm:$0xff]   ;;  %v193_v4 = vld [vmem:[#allocation2 + $0x20] sm:$0xff]   ;;  %v194_v5 = vld [vmem:[#allocation2 + $0x18] sm:$0xff]  }
   0xf   :  { %166 = vmatpush3.bf16.msra.mxu0 %v190_v1  ;;  %v195_v6 = vld [vmem:[#allocation2 + $0x10] sm:$0xff]   ;;  %v196_v7 = vld [vmem:[#allocation2 + $0x8] sm:$0xff]   ;;  %v197_v8 = vld [vmem:[#allocation2] sm:$0xff]  }
  0x10   :  { %167 = vmatprep.subr.bf16.mxu0 %v223_v0  ;;  %v29_v9 = vld [vmem:[%s257_s0] sm:$0xf] }
  0x11   :  { %v147_v10 = vld [vmem:[%s259_s2] ss:$0 sm:$0xff] }
  0x13   :  { %168 = vmatpush3.bf16.msra.mxu0 %v191_v2 }
  0x14   :  { %169 = vmatprep.subr.bf16.mxu0 %v223_v0 }
  0x17   :  { %170 = vmatpush3.bf16.msra.mxu0 %v192_v3 }
  0x18   :  { %171 = vmatprep.subr.bf16.mxu0 %v223_v0 }
  0x1b   :  { %172 = vmatpush3.bf16.msra.mxu0 %v193_v4 }
  0x1c   :  { %173 = vmatprep.subr.bf16.mxu0 %v223_v0 }
  0x1f   :  { %174 = vmatpush3.bf16.msra.mxu0 %v194_v5 }
  0x20   :  { %175 = vmatprep.subr.bf16.mxu0 %v223_v0 }
  0x23   :  { %176 = vmatpush3.bf16.msra.mxu0 %v195_v6 }
  0x24   :  { %177 = vmatprep.subr.bf16.mxu0 %v223_v0 }
  0x27   :  { %178 = vmatpush3.bf16.msra.mxu0 %v196_v7 }
  0x28   :  { %179 = vmatprep.subr.bf16.mxu0 %v223_v0 }
  0x2b   :  { %180 = vmatpush3.bf16.msra.mxu0 %v197_v8 }
  0x2e   :  { %182 = vmatmul.mubr.bf16.vlgmr.msra.gmra.mxu0 %v29_v9 }
  0xee   :  { %v135_v11 = vpop.f32.mrf.mxu0 }
  0xef   :  { %v136_v12 = vadd.f32 %v147_v10, %v135_v11 }
  0xf0   :  { %v183_v13 = vpop.f32.mrf.mxu0 }
  0xf1   :  { %141 = vst [vmem:[%s260_s3] sm:$0xff] %v136_v12 }
  0xf2   :  { %v138_v14 = vpop.f32.mrf.mxu0 }
  0xf4   :  { %v184_v15 = vpop.f32.mrf.mxu0 }
  0xf5   :  { %146 = vsyncpa [#allocation3], 1 }

</bundles_post_ra>
